<compile_context>
chip_gen: v5e
topology: v5e:2x2
jax: 0.10.0
libtpu: 0.0.40
codegen_flags: <defaults>
</compile_context>

<pallas_src>
import jax
import jax.numpy as jnp
from jax import lax
from jax.experimental import pallas as pl
from jax.experimental.pallas import tpu as pltpu


LANE = 128


# ---------------- parameter packing (one-time, at param setup) ---------------

def _align8(n):
    return ((n + 7) // 8) * 8


def _align_lane(n):
    return ((n + LANE - 1) // LANE) * LANE


def pack_latent_encoder_params(params, d_x, batch_size, n_context):
    """Pack all LatentEncoder weights/biases (plus the precomputed context
    averaging operator) into one 2-D f32 buffer with a 128-wide column layout.

    params: dict with
      'mlp'         : list of (w, b); w (in, out), b (1, out)
      'penultimate' : (wp, bp)
      'mean'        : (wm, bm)
      'std'         : (ws, bs)
    (weights stored as (in_features, out_features), i.e. transposed vs torch)
    """
    L = len(params["mlp"])
    num_latents = int(params["mean"][0].shape[1])
    B, n_c = int(batch_size), int(n_context)

    w1, b1 = params["mlp"][0]

    # Context-mean operator, precomputed once.  When L >= 2 the 1/n_c scale is
    # folded into w{L-1}, so this is a pure 0/1 group-sum indicator; for a
    # single-layer MLP the scale is baked in here instead.
    scale = 1.0 if L >= 2 else 1.0 / n_c
    rr = jnp.arange(B, dtype=jnp.int32)[:, None]
    cc = jnp.arange(B * n_c, dtype=jnp.int32)[None, :]
    avg = (((cc >= rr * n_c) & (cc < (rr + 1) * n_c)).astype(jnp.float32)
           * jnp.float32(scale))

    # (name, array, pad_rows_to_full_width?)  Row padding is applied to every
    # weight that consumes a column-padded (128-wide) activation.
    entries = [
        ("wx", w1[:d_x], False),     # (d_x, h0): concat folded into split W
        ("wy", w1[d_x:], False),     # (d_y, h0)
        ("b0", b1, False),           # (1, h0)
    ]
    for i in range(1, L):
        w, b = params["mlp"][i]
        if i == L - 1:
            w = w * (1.0 / n_c)      # fold context-mean scale (exact: linear)
        entries.append((f"w{i}", w, True))
        entries.append((f"b{i}", b, False))
    entries.append(("avg", avg, False))
    wp, bp = params["penultimate"]
    entries.append(("wp", wp, True))
    entries.append(("bp", bp, False))
    wm, bm = params["mean"]
    ws, bs = params["std"]
    entries.append(("wh", jnp.concatenate([wm, ws], axis=1), True))   # fused heads
    entries.append(("bh", jnp.concatenate([bm, bs], axis=1), False))

    max_true_cols = max(int(a.shape[1]) for _, a, _ in entries)
    cols = max(LANE, _align_lane(max_true_cols))    # lane-dense uniform width

    layout = {}
    blocks = []
    r0 = 0
    for name, a, pad_rows in entries:
        a = jnp.asarray(a, jnp.float32)
        nr, nc = int(a.shape[0]), int(a.shape[1])
        target_rows = cols if pad_rows else nr
        a = jnp.pad(a, ((0, target_rows - nr), (0, cols - nc)))
        layout[name] = (r0, target_rows)            # 8-aligned start, row count
        stored_rows = _align8(target_rows)
        if stored_rows != target_rows:
            a = jnp.pad(a, ((0, stored_rows - target_rows), (0, 0)))
        blocks.append(a)
        r0 += stored_rows
    pbuf = jnp.concatenate(blocks, axis=0)          # (total_rows, cols) f32

    return {"pbuf": pbuf, "layout": layout, "n_mlp_layers": L,
            "num_latents": num_latents, "cols": cols, "bn": (B, n_c)}


# ------------------------------- kernel --------------------------------------

def _make_latent_encoder_kernel(layout, n_mlp_layers, B, n_ctx_rows,
                                num_latents):
    L = n_mlp_layers

    def full(p_ref, name):
        # Full-lane-width, 8-row-aligned static slice: zero-cost view.
        r0, nr = layout[name]
        return p_ref[r0:r0 + nr, :]

    def kernel(x_ref, y_ref, p_ref, out_ref):
        # x_ref: (B*n_c, d_x), y_ref: (B*n_c, d_y)  (flattened in the wrapper)
        x2 = x_ref[...]
        y2 = y_ref[...]

        # ---- first MLP linear (concat folded into two matmuls) ----
        h = (jnp.dot(x2, full(p_ref, "wx"), preferred_element_type=jnp.float32)
             + jnp.dot(y2, full(p_ref, "wy"), preferred_element_type=jnp.float32)
             + full(p_ref, "b0"))

        # ---- middle MLP layers: (ReLU, Linear), all except the last ----
        for i in range(1, L - 1):
            h = (jnp.dot(jnp.maximum(h, 0.0), full(p_ref, f"w{i}"),
                         preferred_element_type=jnp.float32)
                 + full(p_ref, f"b{i}"))

        # ---- context mean via precomputed operator (MXU matmul) ----
        r0a, _ = layout["avg"]
        # Tiny (B, B*n_c) read; width is data-shape dependent so it stays a
        # narrow slice (only partial read left in the kernel).
        avg = p_ref[r0a:r0a + B, 0:n_ctx_rows]

        if L >= 2:
            # mean BEFORE the last MLP linear (exact: mean is linear and the
            # ReLU of the reference precedes that linear); 1/n_c is already
            # folded into w{L-1} at pack time.
            r = jnp.maximum(h, 0.0)
            s = jnp.dot(avg, r, preferred_element_type=jnp.float32)   # (B, 128)
            m = (jnp.dot(s, full(p_ref, f"w{L - 1}"),
                         preferred_element_type=jnp.float32)
                 + full(p_ref, f"b{L - 1}"))
        else:
            m = jnp.dot(avg, h, preferred_element_type=jnp.float32)   # avg has 1/n_c

        # ---- penultimate layer + ReLU ----
        hp = jnp.maximum(
            jnp.dot(m, full(p_ref, "wp"), preferred_element_type=jnp.float32)
            + full(p_ref, "bp"), 0.0)

        # ---- fused mean|std heads -> one lane-dense (B, 128) slab ----
        heads = (jnp.dot(hp, full(p_ref, "wh"),
                         preferred_element_type=jnp.float32)
                 + full(p_ref, "bh"))
        lane = lax.broadcasted_iota(jnp.int32, heads.shape, 1)
        sig = 0.1 + 0.9 * jax.nn.sigmoid(heads)
        out_ref[...] = jnp.where(lane < num_latents, heads, sig).astype(
            out_ref.dtype)

    return kernel


# ------------------------------- wrapper --------------------------------------

def latent_encoder_forward(x, y, packed):
    """Pallas implementation of LatentEncoder.forward.

    Returns (mu, sigma) — the Normal(loc, scale) parameters of the module.
    Assumes batch-major contiguous (B, n_c, d) inputs (the precomputed
    averaging operator hard-codes row order b*n_c + c).
    """
    B, n_c, d_x = x.shape
    d_y = y.shape[-1]
    num_latents = packed["num_latents"]
    cols = packed["cols"]
    assert (B, n_c) == packed["bn"], "pbuf was packed for a different (B, n_c)"

    # Flatten contiguous leading dims in the wrapper (layout-free reshape).
    x2 = jnp.asarray(x, jnp.float32).reshape(B * n_c, d_x)
    y2 = jnp.asarray(y, jnp.float32).reshape(B * n_c, d_y)

    kernel = _make_latent_encoder_kernel(packed["layout"],
                                         packed["n_mlp_layers"],
                                         B, B * n_c, num_latents)
    out = pl.pallas_call(
        kernel,
        out_shape=jax.ShapeDtypeStruct((B, cols), jnp.float32),  # lane-dense slab
        in_specs=[pl.BlockSpec(memory_space=pltpu.MemorySpace.VMEM)] * 3,
        out_specs=pl.BlockSpec(memory_space=pltpu.MemorySpace.VMEM),
    )(x2, y2, packed["pbuf"])
    mu = out[:, :num_latents]
    sigma = out[:, num_latents:2 * num_latents]
    return mu, sigma


# ------------------------- reference + test harness --------------------------

def _reference_forward(x, y, params):
    """Pure-JAX reference mirroring the PyTorch module."""
    h = jnp.concatenate([x, y], axis=-1).astype(jnp.float32)
    for i, (w, b) in enumerate(params["mlp"]):
        if i > 0:
            h = jnp.maximum(h, 0.0)
        h = h @ w + b
    h = jnp.mean(h, axis=1)
    wp, bp = params["penultimate"]
    h = jnp.maximum(h @ wp + bp, 0.0)
    wm, bm = params["mean"]
    ws, bs = params["std"]
    mu = h @ wm + bm
    sigma = 0.1 + 0.9 * jax.nn.sigmoid(h @ ws + bs)
    return mu, sigma


def _init_linear(key, d_in, d_out):
    kw, kb = jax.random.split(key)
    w = jax.random.normal(kw, (d_in, d_out), jnp.float32) * 0.1
    b = jax.random.normal(kb, (1, d_out), jnp.float32) * 0.1
    return w, b


if __name__ == "__main__":
    # Small shapes consistent with the module's forward.
    B, n_c, d_x, d_y = 2, 8, 3, 2
    input_size = d_x + d_y
    output_sizes = [32, 32]
    num_latents = 16
    intermediate_size = (output_sizes[-1] + num_latents) // 2   # 24

    key = jax.random.PRNGKey(0)
    keys = jax.random.split(key, 8)

    x = jax.random.normal(keys[0], (B, n_c, d_x), jnp.float32)
    y = jax.random.normal(keys[1], (B, n_c, d_y), jnp.float32)

    # Deterministic synthetic parameter init (weights as (in, out)).
    mlp_params = []
    d_prev = input_size
    for i, d_out in enumerate(output_sizes):
        mlp_params.append(_init_linear(keys[2 + i], d_prev, d_out))
        d_prev = d_out
    params = {
        "mlp": mlp_params,
        "penultimate": _init_linear(keys[5], output_sizes[-1], intermediate_size),
        "mean": _init_linear(keys[6], intermediate_size, num_latents),
        "std": _init_linear(keys[7], intermediate_size, num_latents),
    }

    # One-time parameter packing (single VMEM buffer for all weights/biases,
    # the context-averaging operator, and the folded 1/n_c scale).
    packed = pack_latent_encoder_params(params, d_x, B, n_c)

    mu, sigma = latent_encoder_forward(x, y, packed)
    jax.block_until_ready((mu, sigma))

    mu_ref, sigma_ref = _reference_forward(x, y, params)
    assert mu.shape == (B, num_latents) and sigma.shape == (B, num_latents)
    # Float-order differs from the reference (mean moved before the last
    # linear, 1/n_c folded into the weight) — keep tolerance at 1e-4.
    assert jnp.allclose(mu, mu_ref, atol=1e-4, rtol=1e-4)
    assert jnp.allclose(sigma, sigma_ref, atol=1e-4, rtol=1e-4)
    assert bool(jnp.all(sigma > 0.0))

    print("KERNEL_OK")
</pallas_src>

<mosaic_0001>
module attributes {stable_mosaic.version = 11 : i64} {
  func.func @kernel(%arg0: memref<16x3xf32, #tpu.memory_space<vmem>>, %arg1: memref<16x2xf32, #tpu.memory_space<vmem>>, %arg2: memref<440x128xf32, #tpu.memory_space<vmem>>, %arg3: memref<2x128xf32, #tpu.memory_space<vmem>>) attributes {dimension_semantics = [], scalar_prefetch = 0 : i64, scratch_operands = 0 : i64, tpu.core_type = #tpu.core_type<tc>} {
    %c0 = arith.constant 0 : index
    %c0_0 = arith.constant 0 : index
    %0 = vector.load %arg0[%c0, %c0_0] : memref<16x3xf32, #tpu.memory_space<vmem>>, vector<16x3xf32>
    %c0_1 = arith.constant 0 : index
    %c0_2 = arith.constant 0 : index
    %1 = vector.load %arg1[%c0_1, %c0_2] : memref<16x2xf32, #tpu.memory_space<vmem>>, vector<16x2xf32>
    %c0_3 = arith.constant 0 : index
    %c0_4 = arith.constant 0 : index
    %2 = vector.load %arg2[%c0_3, %c0_4] : memref<440x128xf32, #tpu.memory_space<vmem>>, vector<3x128xf32>
    %cst = arith.constant dense<0.000000e+00> : vector<16x128xf32>
    %3 = tpu.matmul %0, %2, %cst {dimension_numbers = #tpu.dot_dimension_numbers<[1], [0], [0], [1], [0, 0, 1, 1], [], []>} : vector<16x3xf32>, vector<3x128xf32>, vector<16x128xf32> -> vector<16x128xf32>
    %c8 = arith.constant 8 : index
    %c0_5 = arith.constant 0 : index
    %4 = vector.load %arg2[%c8, %c0_5] : memref<440x128xf32, #tpu.memory_space<vmem>>, vector<2x128xf32>
    %cst_6 = arith.constant dense<0.000000e+00> : vector<16x128xf32>
    %5 = tpu.matmul %1, %4, %cst_6 {dimension_numbers = #tpu.dot_dimension_numbers<[1], [0], [0], [1], [0, 0, 1, 1], [], []>} : vector<16x2xf32>, vector<2x128xf32>, vector<16x128xf32> -> vector<16x128xf32>
    %6 = arith.addf %3, %5 : vector<16x128xf32>
    %c16 = arith.constant 16 : index
    %c0_7 = arith.constant 0 : index
    %7 = vector.load %arg2[%c16, %c0_7] : memref<440x128xf32, #tpu.memory_space<vmem>>, vector<1x128xf32>
    %8 = vector.broadcast %7 : vector<1x128xf32> to vector<16x128xf32>
    %9 = arith.addf %6, %8 : vector<16x128xf32>
    %c160 = arith.constant 160 : index
    %c0_8 = arith.constant 0 : index
    %10 = vector.load %arg2[%c160, %c0_8] : memref<440x128xf32, #tpu.memory_space<vmem>>, vector<2x16xf32>
    %cst_9 = arith.constant 0.000000e+00 : f32
    %11 = vector.broadcast %cst_9 : f32 to vector<16x128xf32>
    %12 = arith.maximumf %9, %11 : vector<16x128xf32>
    %cst_10 = arith.constant dense<0.000000e+00> : vector<2x128xf32>
    %13 = tpu.matmul %10, %12, %cst_10 {dimension_numbers = #tpu.dot_dimension_numbers<[1], [0], [0], [1], [0, 0, 1, 1], [], []>} : vector<2x16xf32>, vector<16x128xf32>, vector<2x128xf32> -> vector<2x128xf32>
    %c24 = arith.constant 24 : index
    %c0_11 = arith.constant 0 : index
    %14 = vector.load %arg2[%c24, %c0_11] : memref<440x128xf32, #tpu.memory_space<vmem>>, vector<128x128xf32>
    %cst_12 = arith.constant dense<0.000000e+00> : vector<2x128xf32>
    %15 = tpu.matmul %13, %14, %cst_12 {dimension_numbers = #tpu.dot_dimension_numbers<[1], [0], [0], [1], [0, 0, 1, 1], [], []>} : vector<2x128xf32>, vector<128x128xf32>, vector<2x128xf32> -> vector<2x128xf32>
    %c152 = arith.constant 152 : index
    %c0_13 = arith.constant 0 : index
    %16 = vector.load %arg2[%c152, %c0_13] : memref<440x128xf32, #tpu.memory_space<vmem>>, vector<1x128xf32>
    %17 = vector.broadcast %16 : vector<1x128xf32> to vector<2x128xf32>
    %18 = arith.addf %15, %17 : vector<2x128xf32>
    %c168 = arith.constant 168 : index
    %c0_14 = arith.constant 0 : index
    %19 = vector.load %arg2[%c168, %c0_14] : memref<440x128xf32, #tpu.memory_space<vmem>>, vector<128x128xf32>
    %cst_15 = arith.constant dense<0.000000e+00> : vector<2x128xf32>
    %20 = tpu.matmul %18, %19, %cst_15 {dimension_numbers = #tpu.dot_dimension_numbers<[1], [0], [0], [1], [0, 0, 1, 1], [], []>} : vector<2x128xf32>, vector<128x128xf32>, vector<2x128xf32> -> vector<2x128xf32>
    %c296 = arith.constant 296 : index
    %c0_16 = arith.constant 0 : index
    %21 = vector.load %arg2[%c296, %c0_16] : memref<440x128xf32, #tpu.memory_space<vmem>>, vector<1x128xf32>
    %22 = vector.broadcast %21 : vector<1x128xf32> to vector<2x128xf32>
    %23 = arith.addf %20, %22 : vector<2x128xf32>
    %cst_17 = arith.constant 0.000000e+00 : f32
    %24 = vector.broadcast %cst_17 : f32 to vector<2x128xf32>
    %25 = arith.maximumf %23, %24 : vector<2x128xf32>
    %c304 = arith.constant 304 : index
    %c0_18 = arith.constant 0 : index
    %26 = vector.load %arg2[%c304, %c0_18] : memref<440x128xf32, #tpu.memory_space<vmem>>, vector<128x128xf32>
    %cst_19 = arith.constant dense<0.000000e+00> : vector<2x128xf32>
    %27 = tpu.matmul %25, %26, %cst_19 {dimension_numbers = #tpu.dot_dimension_numbers<[1], [0], [0], [1], [0, 0, 1, 1], [], []>} : vector<2x128xf32>, vector<128x128xf32>, vector<2x128xf32> -> vector<2x128xf32>
    %c432 = arith.constant 432 : index
    %c0_20 = arith.constant 0 : index
    %28 = vector.load %arg2[%c432, %c0_20] : memref<440x128xf32, #tpu.memory_space<vmem>>, vector<1x128xf32>
    %29 = vector.broadcast %28 : vector<1x128xf32> to vector<2x128xf32>
    %30 = arith.addf %27, %29 : vector<2x128xf32>
    %31 = tpu.iota {dimensions = array<i32: 1>} : vector<2x128xi32>
    %32 = arith.negf %30 : vector<2x128xf32>
    %33 = math.exp %32 : vector<2x128xf32>
    %cst_21 = arith.constant 1.000000e+00 : f32
    %34 = vector.broadcast %cst_21 : f32 to vector<2x128xf32>
    %35 = arith.addf %34, %33 : vector<2x128xf32>
    %36 = arith.divf %34, %35 : vector<2x128xf32>
    %cst_22 = arith.constant 0.899999976 : f32
    %37 = vector.broadcast %cst_22 : f32 to vector<2x128xf32>
    %38 = arith.mulf %37, %36 : vector<2x128xf32>
    %cst_23 = arith.constant 1.000000e-01 : f32
    %39 = vector.broadcast %cst_23 : f32 to vector<2x128xf32>
    %40 = arith.addf %39, %38 : vector<2x128xf32>
    %c16_i32 = arith.constant 16 : i32
    %41 = vector.broadcast %c16_i32 : i32 to vector<2x128xi32>
    %42 = arith.cmpi slt, %31, %41 : vector<2x128xi32>
    %43 = arith.select %42, %30, %40 : vector<2x128xi1>, vector<2x128xf32>
    %c0_24 = arith.constant 0 : index
    %c0_25 = arith.constant 0 : index
    %44 = vector.load %arg3[%c0_24, %c0_25] : memref<2x128xf32, #tpu.memory_space<vmem>>, vector<2x128xf32>
    tpu.vector_store %arg3[%c0_24, %c0_25], %43 {strides = array<i32>} : memref<2x128xf32, #tpu.memory_space<vmem>>, vector<2x128xf32>,
    return
  }
}

</mosaic_0001>

<bundles_post_ra>
// kernel: tpu_custom_call.1
= control target key start
LH: loop header
LB: loop body
LE: loop exit
PB: predicated region body
PF: predicated region fallthrough
CT: control target
= control target key end

     0   :  { %8 = vsyncpa [#allocation3], 0  ;;  %s408_s0 = inlined_call_operand.vmem [shape: f32[16,3], index: 0, kind: input, shape index: {}]   ;;  %s409_s1 = inlined_call_operand.vmem [shape: f32[16,2], index: 1, kind: input, shape index: {}]   ;;  %s410_s2 = inlined_call_operand.hbm [shape: f32[440,128], index: 2, kind: input, shape index: {}]   ;;  %s411_s3 = inlined_call_operand.hbm [shape: f32[2,128], index: 3, kind: output, shape index: {}]  }
   0x1   :  { %9 = vsyncpa [#allocation4], 0  ;;  %s18_s14 = sshll.u32 %s410_s2, 4  ;;  %s366_s15 = smov [#allocation2]   ;;  %s19_s14 = int_to_ptr.hbm [resolvable:$true] %s18_s14 }
   0x2   :  { %s20_s16 = sshll.u32 %s366_s15, 4  ;;  %s367_s17 = smov 128   ;;  %s21_s16 = int_to_ptr.vmem [resolvable:$true] %s20_s16 }
   0x3   :  { %s368_s18 = smov 8  }
   0x4   :  { %26 = dma.hbm_to_vmem [thread:$0]  %s19_s14, 7040, %s21_s16, [#allocation3], %s367_s17, %s367_s17, %s368_s18  }
   0x5   :  { %362 = dma.done.wait [#allocation3], 7040  }
   0x6   :  { %363 = vsyncadd [#allocation3], 4294960256  ;;  %vm44_vm0 = vcmask 1041408   ;;  %vm78_vm1 = vcmask 1042432   ;;  %vm37_vm2 = vcmask 15360   ;;  %vm71_vm3 = vcmask 23552  }
   0x7   :  { %v36_v0 = vld [vmem:[#allocation2 + $0x8] sm:$0x3]  ;;  %v33_v1 = vld [vmem:[%s409_s1] sm:$0xff]  ;;  %v151_v6 = vld [vmem:[#allocation2 + $0x90] sm:$0xff]  ;;  %vm112_vm4 = vcmask 130048   ;;  %s284_s28 = sshll.u32 %s411_s3, 4  ;;  %s285_s28 = int_to_ptr.hbm [resolvable:$true] %s284_s28 }
   0x8   :  { %v35_v2 = vld [vmem:[#allocation2] sm:$0x7]  ;;  %294 = vmatpush.msk.msra.mxu2 %vm44_vm0, %v36_v0  ;;  %v34_v4 = vld [vmem:[%s409_s1 + $0x8] sm:$0xff]  ;;  %154 = vmatpush.msra.mxu3 %v151_v6  ;;  %v148_v9 = vld [vmem:[#allocation2 + $0x78] sm:$0xff] }
   0x9   :  { %297 = vmatpush.msk.msra.mxu1 %vm78_vm1, %v35_v2  ;;  %v31_v3 = vld [vmem:[%s408_s0] sm:$0xff]  ;;  %295 = vmatmul.msk.f32.vlgmr.msra.gmra.mxu2 %vm37_vm2, %v33_v1  ;;  %v32_v5 = vld [vmem:[%s408_s0 + $0x8] sm:$0xff]  ;;  %v147_v10 = vld [vmem:[#allocation2 + $0x70] sm:$0xff]  ;;  %s369_s0 = smov [#allocation5]  }
   0xa   :  { %298 = vmatmul.msk.f32.vlgmr.msra.gmra.mxu1 %vm71_vm3, %v31_v3  ;;  %v150_v7 = vld [vmem:[#allocation2 + $0x88] sm:$0xff]  ;;  %v149_v8 = vld [vmem:[#allocation2 + $0x80] sm:$0xff]  ;;  %v144_v14 = vld [vmem:[#allocation2 + $0x58] sm:$0xff]  ;;  %s282_s1 = sshll.u32 %s369_s0, 4  ;;  %s283_s1 = int_to_ptr.vmem [resolvable:$true] %s282_s1 }
   0xb   :  { %155 = vmatpush.msra.mxu3 %v150_v7  ;;  %v146_v11 = vld [vmem:[#allocation2 + $0x68] sm:$0xff]  ;;  %v145_v13 = vld [vmem:[#allocation2 + $0x60] sm:$0xff]  ;;  %v143_v16 = vld [vmem:[#allocation2 + $0x50] sm:$0xff] }
   0xc   :  { %v142_v17 = vld [vmem:[#allocation2 + $0x48] sm:$0xff]  ;;  %v141_v18 = vld [vmem:[#allocation2 + $0x40] sm:$0xff]  ;;  %v140_v20 = vld [vmem:[#allocation2 + $0x38] sm:$0xff] }
   0xd   :  { %156 = vmatpush.msra.mxu3 %v149_v8  ;;  %v306_v22 = vld [vmem:[#allocation2 + $0x10] ss:$0 sm:$0xff]  ;;  %v138_v26 = vld [vmem:[#allocation2 + $0x28] sm:$0xff]  ;;  %v137_v29 = vld [vmem:[#allocation2 + $0x20] sm:$0xff] }
   0xe   :  { %v139_v24 = vld [vmem:[#allocation2 + $0x30] sm:$0xff]  ;;  %v109_v32 = vld [vmem:[#allocation2 + $0xa0] sm:$0x3]  ;;  %v136_v33 = vld [vmem:[#allocation2 + $0x18] sm:$0xff] }
   0xf   :  { %157 = vmatpush.msra.mxu3 %v148_v9  ;;  %v189_v34 = vld [vmem:[#allocation2 + $0x120] sm:$0xff]  ;;  %v188_v35 = vld [vmem:[#allocation2 + $0x118] sm:$0xff]  ;;  %v187_v36 = vld [vmem:[#allocation2 + $0x110] sm:$0xff] }
  0x10   :  { %192 = vmatpush.msra.mxu0 %v189_v34  ;;  %v186_v37 = vld [vmem:[#allocation2 + $0x108] sm:$0xff]  ;;  %v185_v38 = vld [vmem:[#allocation2 + $0x100] sm:$0xff]  ;;  %v184_v39 = vld [vmem:[#allocation2 + $0xf8] sm:$0xff] }
  0x11   :  { %296 = vmatmul.msk.f32.gmra.mxu2 %vm37_vm2, %v34_v4  ;;  %158 = vmatpush.msra.mxu3 %v147_v10  ;;  %v183_v40 = vld [vmem:[#allocation2 + $0xf0] sm:$0xff]  ;;  %v182_v41 = vld [vmem:[#allocation2 + $0xe8] sm:$0xff]  ;;  %v181_v42 = vld [vmem:[#allocation2 + $0xe0] sm:$0xff] }
  0x12   :  { %299 = vmatmul.msk.f32.gmra.mxu1 %vm71_vm3, %v32_v5  ;;  %193 = vmatpush.msra.mxu0 %v188_v35  ;;  %v180_v43 = vld [vmem:[#allocation2 + $0xd8] sm:$0xff]  ;;  %v179_v44 = vld [vmem:[#allocation2 + $0xd0] sm:$0xff]  ;;  %v178_v45 = vld [vmem:[#allocation2 + $0xc8] sm:$0xff] }
  0x13   :  { %159 = vmatpush.msra.mxu3 %v146_v11  ;;  %v177_v46 = vld [vmem:[#allocation2 + $0xc0] sm:$0xff]  ;;  %v176_v47 = vld [vmem:[#allocation2 + $0xb8] sm:$0xff]  ;;  %v175_v49 = vld [vmem:[#allocation2 + $0xb0] sm:$0xff] }
  0x14   :  { %194 = vmatpush.msra.mxu0 %v187_v36  ;;  %v174_v50 = vld [vmem:[#allocation2 + $0xa8] sm:$0xff]  ;;  %v227_v52 = vld [vmem:[#allocation2 + $0x1a0] sm:$0xff]  ;;  %v226_v53 = vld [vmem:[#allocation2 + $0x198] sm:$0xff] }
  0x15   :  { %160 = vmatpush.msra.mxu3 %v145_v13  ;;  %v228_v51 = vld [vmem:[#allocation2 + $0x1a8] sm:$0xff]  ;;  %v225_v54 = vld [vmem:[#allocation2 + $0x190] sm:$0xff]  ;;  %v223_v56 = vld [vmem:[#allocation2 + $0x180] sm:$0xff] }
  0x16   :  { %195 = vmatpush.msra.mxu0 %v186_v37  ;;  %231 = vmatpush.msrb.mxu1 %v228_v51  ;;  %v224_v55 = vld [vmem:[#allocation2 + $0x188] sm:$0xff]  ;;  %v222_v57 = vld [vmem:[#allocation2 + $0x178] sm:$0xff]  ;;  %v221_v58 = vld [vmem:[#allocation2 + $0x170] sm:$0xff] }
  0x17   :  { %161 = vmatpush.msra.mxu3 %v144_v14  ;;  %v220_v59 = vld [vmem:[#allocation2 + $0x168] sm:$0xff]  ;;  %v219_v60 = vld [vmem:[#allocation2 + $0x160] sm:$0xff]  ;;  %v218_v61 = vld [vmem:[#allocation2 + $0x158] sm:$0xff] }
  0x18   :  { %196 = vmatpush.msra.mxu0 %v185_v38  ;;  %232 = vmatpush.msrb.mxu1 %v227_v52  ;;  %v217_v62 = vld [vmem:[#allocation2 + $0x150] sm:$0xff]  ;;  %v216_v63 = vld [vmem:[#allocation2 + $0x148] sm:$0xff]  ;;  %v307_v0 = vld [vmem:[#allocation2 + $0x98] ss:$0 sm:$0xff] }
  0x19   :  { %162 = vmatpush.msra.mxu3 %v143_v16  ;;  %v215_v3 = vld [vmem:[#allocation2 + $0x140] sm:$0xff]  ;;  %v214_v4 = vld [vmem:[#allocation2 + $0x138] sm:$0xff]  ;;  %v213_v5 = vld [vmem:[#allocation2 + $0x130] sm:$0xff] }
  0x1a   :  { %197 = vmatpush.msra.mxu0 %v184_v39  ;;  %233 = vmatpush.msrb.mxu1 %v226_v53  ;;  %v308_v6 = vld [vmem:[#allocation2 + $0x128] ss:$0 sm:$0xff]  ;;  %v309_v10 = vld [vmem:[#allocation2 + $0x1b0] ss:$0 sm:$0xff] }
  0x1b   :  { %163 = vmatpush.msra.mxu3 %v142_v17 }
  0x1c   :  { %198 = vmatpush.msra.mxu0 %v183_v40  ;;  %234 = vmatpush.msrb.mxu1 %v225_v54 }
  0x1d   :  { %164 = vmatpush.msra.mxu3 %v141_v18 }
  0x1e   :  { %199 = vmatpush.msra.mxu0 %v182_v41  ;;  %235 = vmatpush.msrb.mxu1 %v224_v55 }
  0x1f   :  { %165 = vmatpush.msra.mxu3 %v140_v20 }
  0x20   :  { %200 = vmatpush.msra.mxu0 %v181_v42  ;;  %236 = vmatpush.msrb.mxu1 %v223_v56 }
  0x21   :  { %166 = vmatpush.msra.mxu3 %v139_v24 }
  0x22   :  { %201 = vmatpush.msra.mxu0 %v180_v43  ;;  %237 = vmatpush.msrb.mxu1 %v222_v57 }
  0x23   :  { %167 = vmatpush.msra.mxu3 %v138_v26 }
  0x24   :  { %202 = vmatpush.msra.mxu0 %v179_v44  ;;  %238 = vmatpush.msrb.mxu1 %v221_v58 }
  0x25   :  { %168 = vmatpush.msra.mxu3 %v137_v29 }
  0x26   :  { %203 = vmatpush.msra.mxu0 %v178_v45  ;;  %239 = vmatpush.msrb.mxu1 %v220_v59 }
  0x27   :  { %169 = vmatpush.msra.mxu3 %v136_v33 }
  0x28   :  { %204 = vmatpush.msra.mxu0 %v177_v46  ;;  %240 = vmatpush.msrb.mxu1 %v219_v60 }
  0x2a   :  { %205 = vmatpush.msra.mxu0 %v176_v47  ;;  %241 = vmatpush.msrb.mxu1 %v218_v61 }
  0x2c   :  { %206 = vmatpush.msra.mxu0 %v175_v49  ;;  %242 = vmatpush.msrb.mxu1 %v217_v62 }
  0x2e   :  { %207 = vmatpush.msra.mxu0 %v174_v50  ;;  %243 = vmatpush.msrb.mxu1 %v216_v63 }
  0x30   :  { %244 = vmatpush.msrb.mxu1 %v215_v3 }
  0x32   :  { %245 = vmatpush.msrb.mxu1 %v214_v4 }
  0x34   :  { %246 = vmatpush.msrb.mxu1 %v213_v5 }
  0x87   :  { %v99_v12 = vpop.f32.mrf.mxu1 }
  0x8c   :  { %v65_v15 = vpop.f32.mrf.mxu2 }
  0x8d   :  { %v100_v21 = vadd.f32 %v99_v12, %v65_v15 }
  0x8f   :  { %v102_v19 = vpop.f32.mrf.mxu1  ;;  %v107_v28 = vadd.f32 %v306_v22, %v100_v21 }
  0x91   :  { %v110_v31 = vmax.f32 %v107_v28, 0.0 }
  0x94   :  { %v68_v23 = vpop.f32.mrf.mxu2 }
  0x95   :  { %v103_v25 = vadd.f32 %v102_v19, %v68_v23  ;;  %v251_v19 = vlaneseq }
  0x97   :  { %v108_v27 = vadd.f32 %v306_v22, %v103_v25  ;;  %v252_v24 = vand.u32 127, %v251_v19 }
  0x99   :  { %v111_v30 = vmax.f32 %v108_v27, 0.0  ;;  %vm274_vm9 = vcmp.lt.s32.totalorder %v252_v24, 16 }
  0x9b   :  { %130 = vmatpush.msrb.mxu2 %v111_v30 }
  0x9d   :  { %131 = vmatpush.msrb.mxu2 %v110_v31 }
  0x9e   :  { %300 = vmatmul.msk.f32.vlgmr.msrb.gmra.mxu2 %vm112_vm4, %v109_v32 }
 0x121   :  { %v133_v48 = vpop.f32.mrf.mxu2 }
 0x122   :  { %170 = vmatmul.f32.vlgmr.msra.gmra.mxu3 %v133_v48 }
 0x1a5   :  { %v171_v1 = vpop.f32.mrf.mxu3 }
 0x1a6   :  { %v172_v2 = vadd.f32 %v307_v0, %v171_v1 }
 0x1a8   :  { %208 = vmatmul.f32.vlgmr.msra.gmra.mxu0 %v172_v2 }
 0x225   :  { %v209_v7 = vpop.f32.mrf.mxu0 }
 0x226   :  { %v210_v8 = vadd.f32 %v308_v6, %v209_v7 }
 0x228   :  { %v212_v9 = vmax.f32 %v210_v8, 0.0 }
 0x22a   :  { %247 = vmatmul.f32.vlgmr.msrb.gmra.mxu1 %v212_v9 }
 0x2a7   :  { %v248_v11 = vpop.f32.mrf.mxu1 }
 0x2a8   :  { %v249_v12 = vadd.f32 %v309_v10, %v248_v11 }
 0x2aa   :  { %v301_v13 = vmul.f32 -1.442695, %v249_v12 }
 0x2ac   :  { %310 = vpow2.f32 %v301_v13 }
 0x2b2   :  { %v311_v14 = vpop.eup %310 }
 0x2b3   :  { %v256_v15 = vadd.f32 1.0, %v311_v14 }
 0x2b5   :  { %312 = vrcp.f32 %v256_v15  ;;  %v268_v20 = vand.u32 2147483648, %v256_v15  ;;  %v266_v22 = vand.u32 2147483647, %v256_v15  ;;  %vm262_vm6 = vweird.f32 %v256_v15 }
 0x2b7   :  { %v269_v25 = vor.u32 1.1754944e-38, %v268_v20  ;;  %vm267_vm8 = vcmp.eq.f32.partialorder %v266_v22, 8.507059e+37 }
 0x2bb   :  { %v313_v16 = vpop.eup %312 }
 0x2bc   :  { %v258_v17 = vmul.f32 %v313_v16, %v256_v15  ;;  %vm263_vm5 = vweird.f32 %v313_v16 }
 0x2bd   :  { %vm264_vm7 = vmor %vm262_vm6, %vm263_vm5 }
 0x2be   :  { %v259_v18 = vsub.f32 1.0, %v258_v17 }
 0x2c0   :  { %v260_v21 = vmul.f32 %v313_v16, %v259_v18 }
 0x2c2   :  { %v261_v23 = vadd.f32 %v313_v16, %v260_v21 }
 0x2c4   :  { %v265_v26 = vsel %vm264_vm7, %v313_v16, %v261_v23 }
 0x2c5   :  { %v270_v27 = vsel %vm267_vm8, %v269_v25, %v265_v26 }
 0x2c6   :  { %v272_v28 = vmul.f32 0.9, %v270_v27 }
 0x2c8   :  { %v273_v29 = vadd.f32 0.1, %v272_v28 }
 0x2ca   :  { %v275_v30 = vsel %vm274_vm9, %v249_v12, %v273_v29 }
 0x2cb   :  { %276 = vst [vmem:[#allocation5] sm:$0x3] %v275_v30 }
 0x2cc   :  { %287 = dma.vmem_to_hbm [thread:$0]  %s283_s1, 32, %s285_s28, [#allocation4]  }
 0x2cd   :  { %364 = dma.done.wait [#allocation4], 32  }
 0x2ce   :  { %365 = vsyncadd [#allocation4], 4294967264 }
 0x2cf   :  { %292 = vsyncpa [#allocation3], 1 }
 0x2d0   :  { %293 = vsyncpa [#allocation4], 1 }

</bundles_post_ra>
